<compile_context>
chip_gen: v5e
topology: v5e:2x2
jax: 0.10.0
libtpu: 0.0.40
codegen_flags: <defaults>
</compile_context>

<pallas_src>
import functools

import jax
import jax.numpy as jnp
import numpy as np
from jax.experimental import pallas as pl
from jax.experimental.pallas import tpu as pltpu


def _round_up(n, m):
    return ((n + m - 1) // m) * m


def _bins(n, s):
    """PyTorch AdaptiveAvgPool2d bin boundaries [start, end) per output index."""
    return [((i * n) // s, ((i + 1) * n + s - 1) // s) for i in range(s)]


@functools.lru_cache(maxsize=None)
def _pool_matrix(H, W, n_rows):
    """Static (n_rows, 35) matrix: column m holds 1/area over the m-th pool bin.

    Columns: [0] = AdaptiveAvgPool(1); [1:10] = AdaptiveAvgPool(3) bins (row-major);
    [10:35] = AdaptiveAvgPool(5) bins (row-major). Positions are flat indices
    p = i*W + j over the VALID 3x3-conv output grid (Ho, Wo); wrap columns
    (j >= Wo) and padded positions (p >= (H-2)*W - 2) get zero weight everywhere.
    """
    Ho, Wo = H - 2, W - 2
    cols = []
    for s in (1, 3, 5):
        for (r0, r1) in _bins(Ho, s):
            for (c0, c1) in _bins(Wo, s):
                col = np.zeros((n_rows,), np.float32)
                inv_area = 1.0 / float((r1 - r0) * (c1 - c0))
                for i in range(r0, r1):
                    for j in range(c0, c1):
                        col[i * W + j] = inv_area
                cols.append(col)
    return np.stack(cols, axis=1)   # (n_rows, 35)


def _mscam_kernel(x_ref, wstk_ref, p_ref, wbin_ref, wexp_ref, o_ref, *,
                  W, HW, n_pix_pad, c_r, b_blk):
    wstk = wstk_ref[...]            # (9*c_r, c1)      mxu dtype
    pmat = p_ref[...]               # (n_pix_pad, 35)  mxu dtype
    wbin = wbin_ref[...]            # (c_r, 44)        f32   [w1 | w2 | w3 | w4]
    wexp = wexp_ref[...]            # (c1, 4*c_r)      f32

    # Unrolled per-batch loop (b_blk <= 2 here). For larger batch blocks, convert
    # to lax.fori_loop(..., unroll=True) to bound live ranges.
    for b in range(b_blk):
        x_b = x_ref[b]                                   # (c1, hw_pad), input dtype

        # ---- channel_reduction: 3x3 VALID conv -------------------------------
        # One stacked MXU matmul over all 9 taps, then accumulate lane-shifted
        # per-tap products (small c_r-row tensors -> cheap XLU lane moves).
        t_all = jnp.dot(wstk, x_b,
                        preferred_element_type=jnp.float32)   # (9*c_r, hw_pad) f32
        y = t_all[0:c_r, 0:n_pix_pad]
        for di in range(3):
            for dj in range(3):
                k = di * 3 + dj
                if k == 0:
                    continue
                off = di * W + dj
                y = y + t_all[k * c_r:(k + 1) * c_r, off:off + n_pix_pad]
        y = y * jax.nn.sigmoid(y)                             # SiLU, f32

        # ---- all adaptive-average-pool bins in one matmul --------------------
        pooled = jnp.dot(y.astype(pmat.dtype), pmat,
                         preferred_element_type=jnp.float32)  # (c_r, 35)

        # ---- depthwise branch convs = weighted bin sums -----------------------
        y1 = wbin[:, 0:1] * pooled[:, 0:1]                                      # (c_r, 1)
        y2 = jnp.sum(wbin[:, 1:10] * pooled[:, 1:10], axis=1, keepdims=True)    # (c_r, 1)
        y3 = jnp.sum(wbin[:, 10:19] * pooled[:, 1:10], axis=1, keepdims=True)   # (c_r, 1)
        y4 = jnp.sum(wbin[:, 19:44] * pooled[:, 10:35], axis=1, keepdims=True)  # (c_r, 1)
        ycat = jnp.concatenate([y1, y2, y3, y4], axis=0)                        # (4*c_r, 1)

        # ---- channel_expansion (1x1 conv) + sigmoid ---------------------------
        att = jax.nn.sigmoid(
            jnp.dot(wexp, ycat, preferred_element_type=jnp.float32))            # (c1, 1)

        # ---- scale x in the source dtype; aligned, lane-dense store -----------
        x_img = x_b[:, 0:HW]
        o_ref[b] = (x_img * att.astype(x_img.dtype)).astype(o_ref.dtype)


def mscam_v3(x, w_red, w1, w2, w3, w4, w_exp, *, batch_block=None):
    B, c1, H, W = x.shape
    c_r = w_red.shape[0]
    assert H >= 3 and W >= 3
    if batch_block is None:
        batch_block = B            # single grid step on 1-TC parts (v5e / v6e)
    assert B % batch_block == 0

    HW = H * W
    n_pix = (H - 2) * W - 2                       # flat valid-ish conv positions
    n_pix_pad = _round_up(n_pix, 128)             # lane-aligned pooling contraction
    hw_pad = _round_up(n_pix_pad + 2 * W + 2, 128)  # room for all 9 tap shifts

    # Lane-dense, zero-padded layout: spatial dims flattened onto the lane axis.
    x_flat = x.reshape(B, c1, HW)
    x_pad = jnp.pad(x_flat, ((0, 0), (0, 0), (0, hw_pad - HW)))

    # bf16 inputs run the MXU in bf16; otherwise stay in f32 (toy / test path).
    mxu_dtype = jnp.bfloat16 if x.dtype == jnp.bfloat16 else jnp.float32

    # Stacked conv weights: wstk[(di*3+dj)*c_r + co, ci] = w_red[co, ci, di, dj].
    wstk = jnp.transpose(w_red, (2, 3, 0, 1)).reshape(9 * c_r, c1).astype(mxu_dtype)
    pmat = jnp.asarray(_pool_matrix(H, W, n_pix_pad), dtype=mxu_dtype)  # (n_pix_pad, 35)
    wbin = jnp.concatenate(
        [w1.reshape(c_r, 1), w2.reshape(c_r, 9),
         w3.reshape(c_r, 9), w4.reshape(c_r, 25)], axis=1).astype(jnp.float32)
    wexp2d = w_exp.reshape(c1, 4 * c_r).astype(jnp.float32)

    kernel = functools.partial(_mscam_kernel, W=W, HW=HW, n_pix_pad=n_pix_pad,
                               c_r=c_r, b_blk=batch_block)

    def const2d(shape):
        return pl.BlockSpec(shape, lambda b: (0, 0))

    grid_spec = pltpu.PrefetchScalarGridSpec(
        num_scalar_prefetch=0,
        grid=(B // batch_block,),
        in_specs=[
            pl.BlockSpec((batch_block, c1, hw_pad), lambda b: (b, 0, 0)),
            const2d(wstk.shape),
            const2d(pmat.shape),
            const2d(wbin.shape),
            const2d(wexp2d.shape),
        ],
        out_specs=pl.BlockSpec((batch_block, c1, HW), lambda b: (b, 0, 0)),
    )

    out_flat = pl.pallas_call(
        kernel,
        out_shape=jax.ShapeDtypeStruct((B, c1, HW), x.dtype),
        grid_spec=grid_spec,
        compiler_params=pltpu.CompilerParams(
            dimension_semantics=("parallel",)),
    )(x_pad, wstk, pmat, wbin, wexp2d)

    return out_flat.reshape(B, c1, H, W)


def reference(x, w_red, w1, w2, w3, w4, w_exp):
    """Pure-JAX reference of the PyTorch forward (for correctness check)."""
    y = jax.lax.conv_general_dilated(
        x, w_red, window_strides=(1, 1), padding='VALID',
        dimension_numbers=('NCHW', 'OIHW', 'NCHW'),
        precision=jax.lax.Precision.HIGHEST)
    y = y * jax.nn.sigmoid(y)                            # SiLU

    def adaptive_pool(a, s):
        _, _, hh, ww = a.shape
        rows = []
        for (si, ei) in _bins(hh, s):
            cols = [jnp.mean(a[:, :, si:ei, sj:ej], axis=(2, 3))
                    for (sj, ej) in _bins(ww, s)]
            rows.append(jnp.stack(cols, axis=-1))
        return jnp.stack(rows, axis=-2)                  # (B, C, s, s)

    y1 = adaptive_pool(y, 1) * w1[None, :, 0]
    y2 = jnp.sum(adaptive_pool(y, 3) * w2[None, :, 0], axis=(2, 3), keepdims=True)
    y3 = jnp.sum(adaptive_pool(y, 3) * w3[None, :, 0], axis=(2, 3), keepdims=True)
    y4 = jnp.sum(adaptive_pool(y, 5) * w4[None, :, 0], axis=(2, 3), keepdims=True)
    y_cat = jnp.concatenate([y1, y2, y3, y4], axis=1)    # (B, 4*c_, 1, 1)
    att = jnp.sum(y_cat[:, None, :, 0, 0] * w_exp[None, :, :, 0, 0], axis=2)
    att = jax.nn.sigmoid(att)[:, :, None, None]
    return x * att


if __name__ == "__main__":
    B, c1, H, W = 2, 8, 16, 16
    c_r = 4  # c_ in the PyTorch module

    key = jax.random.PRNGKey(0)
    ks = jax.random.split(key, 7)
    x = jax.random.normal(ks[0], (B, c1, H, W), jnp.float32)
    w_red = jax.random.normal(ks[1], (c_r, c1, 3, 3), jnp.float32) * 0.2
    w1 = jax.random.normal(ks[2], (c_r, 1, 1, 1), jnp.float32) * 0.2
    w2 = jax.random.normal(ks[3], (c_r, 1, 3, 3), jnp.float32) * 0.2
    w3 = jax.random.normal(ks[4], (c_r, 1, 3, 3), jnp.float32) * 0.2
    w4 = jax.random.normal(ks[5], (c_r, 1, 5, 5), jnp.float32) * 0.2
    w_exp = jax.random.normal(ks[6], (c1, 4 * c_r, 1, 1), jnp.float32) * 0.2

    out = jax.block_until_ready(
        jax.jit(mscam_v3)(x, w_red, w1, w2, w3, w4, w_exp))
    ref = jax.block_until_ready(reference(x, w_red, w1, w2, w3, w4, w_exp))

    assert out.shape == x.shape
    # f32 inputs keep the MXU on the f32 path with f32 accumulation; small slack
    # for multi-pass MXU rounding vs the HIGHEST-precision XLA reference.
    np.testing.assert_allclose(np.asarray(out), np.asarray(ref),
                               rtol=5e-4, atol=5e-4)
    print("KERNEL_OK")
</pallas_src>

<mosaic_0001>
module attributes {stable_mosaic.version = 11 : i64} {
  func.func @_mscam_kernel(%arg0: i32, %arg1: memref<2x8x384xf32, #tpu.memory_space<vmem>>, %arg2: memref<36x8xf32, #tpu.memory_space<vmem>>, %arg3: memref<256x35xf32, #tpu.memory_space<vmem>>, %arg4: memref<4x44xf32, #tpu.memory_space<vmem>>, %arg5: memref<8x16xf32, #tpu.memory_space<vmem>>, %arg6: memref<2x8x256xf32, #tpu.memory_space<vmem>>) attributes {dimension_semantics = [#tpu.dimension_semantics<parallel>], iteration_bounds = array<i64: 1>, scalar_prefetch = 0 : i64, scratch_operands = 0 : i64, tpu.core_type = #tpu.core_type<tc>, window_params = [{transform_indices = @transform_0, window_bounds = array<i64: 2, 8, 384>}, {pipeline_mode = #tpu.pipeline_mode<synchronous>, transform_indices = @transform_1, window_bounds = array<i64: 36, 8>}, {pipeline_mode = #tpu.pipeline_mode<synchronous>, transform_indices = @transform_2, window_bounds = array<i64: 256, 35>}, {pipeline_mode = #tpu.pipeline_mode<synchronous>, transform_indices = @transform_3, window_bounds = array<i64: 4, 44>}, {pipeline_mode = #tpu.pipeline_mode<synchronous>, transform_indices = @transform_4, window_bounds = array<i64: 8, 16>}, {transform_indices = @transform_5, window_bounds = array<i64: 2, 8, 256>}]} {
    %c0 = arith.constant 0 : index
    %c0_0 = arith.constant 0 : index
    %0 = vector.load %arg2[%c0, %c0_0] : memref<36x8xf32, #tpu.memory_space<vmem>>, vector<36x8xf32>
    %c0_1 = arith.constant 0 : index
    %c0_2 = arith.constant 0 : index
    %1 = vector.load %arg3[%c0_1, %c0_2] : memref<256x35xf32, #tpu.memory_space<vmem>>, vector<256x35xf32>
    %c0_3 = arith.constant 0 : index
    %c0_4 = arith.constant 0 : index
    %2 = vector.load %arg4[%c0_3, %c0_4] : memref<4x44xf32, #tpu.memory_space<vmem>>, vector<4x44xf32>
    %c0_5 = arith.constant 0 : index
    %c0_6 = arith.constant 0 : index
    %3 = vector.load %arg5[%c0_5, %c0_6] : memref<8x16xf32, #tpu.memory_space<vmem>>, vector<8x16xf32>
    %c0_7 = arith.constant 0 : index
    %c0_8 = arith.constant 0 : index
    %c0_9 = arith.constant 0 : index
    %4 = vector.load %arg1[%c0_7, %c0_8, %c0_9] : memref<2x8x384xf32, #tpu.memory_space<vmem>>, vector<1x8x384xf32>
    %5 = vector.shape_cast %4 : vector<1x8x384xf32> to vector<8x384xf32>
    %cst = arith.constant dense<0.000000e+00> : vector<36x384xf32>
    %6 = tpu.matmul %0, %5, %cst {dimension_numbers = #tpu.dot_dimension_numbers<[1], [0], [0], [1], [0, 0, 1, 1], [], []>} : vector<36x8xf32>, vector<8x384xf32>, vector<36x384xf32> -> vector<36x384xf32>
    %7 = vector.extract_strided_slice %6 {offsets = [0, 0], sizes = [4, 256], strides = [1, 1]} : vector<36x384xf32> to vector<4x256xf32>
    %8 = vector.extract_strided_slice %6 {offsets = [4, 1], sizes = [4, 256], strides = [1, 1]} : vector<36x384xf32> to vector<4x256xf32>
    %9 = arith.addf %7, %8 : vector<4x256xf32>
    %10 = vector.extract_strided_slice %6 {offsets = [8, 2], sizes = [4, 256], strides = [1, 1]} : vector<36x384xf32> to vector<4x256xf32>
    %11 = arith.addf %9, %10 : vector<4x256xf32>
    %12 = vector.extract_strided_slice %6 {offsets = [12, 16], sizes = [4, 256], strides = [1, 1]} : vector<36x384xf32> to vector<4x256xf32>
    %13 = arith.addf %11, %12 : vector<4x256xf32>
    %14 = vector.extract_strided_slice %6 {offsets = [16, 17], sizes = [4, 256], strides = [1, 1]} : vector<36x384xf32> to vector<4x256xf32>
    %15 = arith.addf %13, %14 : vector<4x256xf32>
    %16 = vector.extract_strided_slice %6 {offsets = [20, 18], sizes = [4, 256], strides = [1, 1]} : vector<36x384xf32> to vector<4x256xf32>
    %17 = arith.addf %15, %16 : vector<4x256xf32>
    %18 = vector.extract_strided_slice %6 {offsets = [24, 32], sizes = [4, 256], strides = [1, 1]} : vector<36x384xf32> to vector<4x256xf32>
    %19 = arith.addf %17, %18 : vector<4x256xf32>
    %20 = vector.extract_strided_slice %6 {offsets = [28, 33], sizes = [4, 256], strides = [1, 1]} : vector<36x384xf32> to vector<4x256xf32>
    %21 = arith.addf %19, %20 : vector<4x256xf32>
    %22 = vector.extract_strided_slice %6 {offsets = [32, 34], sizes = [4, 256], strides = [1, 1]} : vector<36x384xf32> to vector<4x256xf32>
    %23 = arith.addf %21, %22 : vector<4x256xf32>
    %24 = arith.negf %23 : vector<4x256xf32>
    %25 = math.exp %24 : vector<4x256xf32>
    %cst_10 = arith.constant 1.000000e+00 : f32
    %26 = vector.broadcast %cst_10 : f32 to vector<4x256xf32>
    %27 = arith.addf %26, %25 : vector<4x256xf32>
    %28 = arith.divf %26, %27 : vector<4x256xf32>
    %29 = arith.mulf %23, %28 : vector<4x256xf32>
    %cst_11 = arith.constant dense<0.000000e+00> : vector<4x35xf32>
    %30 = tpu.matmul %29, %1, %cst_11 {dimension_numbers = #tpu.dot_dimension_numbers<[1], [0], [0], [1], [0, 0, 1, 1], [], []>} : vector<4x256xf32>, vector<256x35xf32>, vector<4x35xf32> -> vector<4x35xf32>
    %31 = vector.extract_strided_slice %2 {offsets = [0, 0], sizes = [4, 1], strides = [1, 1]} : vector<4x44xf32> to vector<4x1xf32>
    %32 = vector.extract_strided_slice %30 {offsets = [0, 0], sizes = [4, 1], strides = [1, 1]} : vector<4x35xf32> to vector<4x1xf32>
    %33 = arith.mulf %31, %32 : vector<4x1xf32>
    %34 = vector.extract_strided_slice %2 {offsets = [0, 1], sizes = [4, 9], strides = [1, 1]} : vector<4x44xf32> to vector<4x9xf32>
    %35 = vector.extract_strided_slice %30 {offsets = [0, 1], sizes = [4, 9], strides = [1, 1]} : vector<4x35xf32> to vector<4x9xf32>
    %36 = arith.mulf %34, %35 : vector<4x9xf32>
    %cst_12 = arith.constant dense<0.000000e+00> : vector<4xf32>
    %37 = vector.multi_reduction <add>, %36, %cst_12 [1] : vector<4x9xf32> to vector<4xf32>
    %38 = vector.shape_cast %37 : vector<4xf32> to vector<4x1xf32>
    %39 = vector.extract_strided_slice %2 {offsets = [0, 10], sizes = [4, 9], strides = [1, 1]} : vector<4x44xf32> to vector<4x9xf32>
    %40 = vector.extract_strided_slice %30 {offsets = [0, 1], sizes = [4, 9], strides = [1, 1]} : vector<4x35xf32> to vector<4x9xf32>
    %41 = arith.mulf %39, %40 : vector<4x9xf32>
    %cst_13 = arith.constant dense<0.000000e+00> : vector<4xf32>
    %42 = vector.multi_reduction <add>, %41, %cst_13 [1] : vector<4x9xf32> to vector<4xf32>
    %43 = vector.shape_cast %42 : vector<4xf32> to vector<4x1xf32>
    %44 = vector.extract_strided_slice %2 {offsets = [0, 19], sizes = [4, 25], strides = [1, 1]} : vector<4x44xf32> to vector<4x25xf32>
    %45 = vector.extract_strided_slice %30 {offsets = [0, 10], sizes = [4, 25], strides = [1, 1]} : vector<4x35xf32> to vector<4x25xf32>
    %46 = arith.mulf %44, %45 : vector<4x25xf32>
    %cst_14 = arith.constant dense<0.000000e+00> : vector<4xf32>
    %47 = vector.multi_reduction <add>, %46, %cst_14 [1] : vector<4x25xf32> to vector<4xf32>
    %48 = vector.shape_cast %47 : vector<4xf32> to vector<4x1xf32>
    %49 = tpu.concatenate %33, %38, %43, %48 in 0 : vector<4x1xf32>, vector<4x1xf32>, vector<4x1xf32>, vector<4x1xf32> -> vector<16x1xf32>
    %cst_15 = arith.constant dense<0.000000e+00> : vector<8x1xf32>
    %50 = tpu.matmul %3, %49, %cst_15 {dimension_numbers = #tpu.dot_dimension_numbers<[1], [0], [0], [1], [0, 0, 1, 1], [], []>} : vector<8x16xf32>, vector<16x1xf32>, vector<8x1xf32> -> vector<8x1xf32>
    %51 = arith.negf %50 : vector<8x1xf32>
    %52 = math.exp %51 : vector<8x1xf32>
    %cst_16 = arith.constant 1.000000e+00 : f32
    %53 = vector.broadcast %cst_16 : f32 to vector<8x1xf32>
    %54 = arith.addf %53, %52 : vector<8x1xf32>
    %55 = arith.divf %53, %54 : vector<8x1xf32>
    %56 = vector.extract_strided_slice %5 {offsets = [0, 0], sizes = [8, 256], strides = [1, 1]} : vector<8x384xf32> to vector<8x256xf32>
    %57 = vector.broadcast %55 : vector<8x1xf32> to vector<8x256xf32>
    %58 = arith.mulf %56, %57 : vector<8x256xf32>
    %c0_17 = arith.constant 0 : index
    %c0_18 = arith.constant 0 : index
    %c0_19 = arith.constant 0 : index
    %59 = vector.load %arg6[%c0_17, %c0_18, %c0_19] : memref<2x8x256xf32, #tpu.memory_space<vmem>>, vector<1x8x256xf32>
    %60 = vector.shape_cast %59 : vector<1x8x256xf32> to vector<8x256xf32>
    %61 = vector.shape_cast %58 : vector<8x256xf32> to vector<1x8x256xf32>
    tpu.vector_store %arg6[%c0_17, %c0_18, %c0_19], %61 {strides = array<i32>} : memref<2x8x256xf32, #tpu.memory_space<vmem>>, vector<1x8x256xf32>,
    %c1 = arith.constant 1 : index
    %c0_20 = arith.constant 0 : index
    %c0_21 = arith.constant 0 : index
    %62 = vector.load %arg1[%c1, %c0_20, %c0_21] : memref<2x8x384xf32, #tpu.memory_space<vmem>>, vector<1x8x384xf32>
    %63 = vector.shape_cast %62 : vector<1x8x384xf32> to vector<8x384xf32>
    %cst_22 = arith.constant dense<0.000000e+00> : vector<36x384xf32>
    %64 = tpu.matmul %0, %63, %cst_22 {dimension_numbers = #tpu.dot_dimension_numbers<[1], [0], [0], [1], [0, 0, 1, 1], [], []>} : vector<36x8xf32>, vector<8x384xf32>, vector<36x384xf32> -> vector<36x384xf32>
    %65 = vector.extract_strided_slice %64 {offsets = [0, 0], sizes = [4, 256], strides = [1, 1]} : vector<36x384xf32> to vector<4x256xf32>
    %66 = vector.extract_strided_slice %64 {offsets = [4, 1], sizes = [4, 256], strides = [1, 1]} : vector<36x384xf32> to vector<4x256xf32>
    %67 = arith.addf %65, %66 : vector<4x256xf32>
    %68 = vector.extract_strided_slice %64 {offsets = [8, 2], sizes = [4, 256], strides = [1, 1]} : vector<36x384xf32> to vector<4x256xf32>
    %69 = arith.addf %67, %68 : vector<4x256xf32>
    %70 = vector.extract_strided_slice %64 {offsets = [12, 16], sizes = [4, 256], strides = [1, 1]} : vector<36x384xf32> to vector<4x256xf32>
    %71 = arith.addf %69, %70 : vector<4x256xf32>
    %72 = vector.extract_strided_slice %64 {offsets = [16, 17], sizes = [4, 256], strides = [1, 1]} : vector<36x384xf32> to vector<4x256xf32>
    %73 = arith.addf %71, %72 : vector<4x256xf32>
    %74 = vector.extract_strided_slice %64 {offsets = [20, 18], sizes = [4, 256], strides = [1, 1]} : vector<36x384xf32> to vector<4x256xf32>
    %75 = arith.addf %73, %74 : vector<4x256xf32>
    %76 = vector.extract_strided_slice %64 {offsets = [24, 32], sizes = [4, 256], strides = [1, 1]} : vector<36x384xf32> to vector<4x256xf32>
    %77 = arith.addf %75, %76 : vector<4x256xf32>
    %78 = vector.extract_strided_slice %64 {offsets = [28, 33], sizes = [4, 256], strides = [1, 1]} : vector<36x384xf32> to vector<4x256xf32>
    %79 = arith.addf %77, %78 : vector<4x256xf32>
    %80 = vector.extract_strided_slice %64 {offsets = [32, 34], sizes = [4, 256], strides = [1, 1]} : vector<36x384xf32> to vector<4x256xf32>
    %81 = arith.addf %79, %80 : vector<4x256xf32>
    %82 = arith.negf %81 : vector<4x256xf32>
    %83 = math.exp %82 : vector<4x256xf32>
    %cst_23 = arith.constant 1.000000e+00 : f32
    %84 = vector.broadcast %cst_23 : f32 to vector<4x256xf32>
    %85 = arith.addf %84, %83 : vector<4x256xf32>
    %86 = arith.divf %84, %85 : vector<4x256xf32>
    %87 = arith.mulf %81, %86 : vector<4x256xf32>
    %cst_24 = arith.constant dense<0.000000e+00> : vector<4x35xf32>
    %88 = tpu.matmul %87, %1, %cst_24 {dimension_numbers = #tpu.dot_dimension_numbers<[1], [0], [0], [1], [0, 0, 1, 1], [], []>} : vector<4x256xf32>, vector<256x35xf32>, vector<4x35xf32> -> vector<4x35xf32>
    %89 = vector.extract_strided_slice %2 {offsets = [0, 0], sizes = [4, 1], strides = [1, 1]} : vector<4x44xf32> to vector<4x1xf32>
    %90 = vector.extract_strided_slice %88 {offsets = [0, 0], sizes = [4, 1], strides = [1, 1]} : vector<4x35xf32> to vector<4x1xf32>
    %91 = arith.mulf %89, %90 : vector<4x1xf32>
    %92 = vector.extract_strided_slice %2 {offsets = [0, 1], sizes = [4, 9], strides = [1, 1]} : vector<4x44xf32> to vector<4x9xf32>
    %93 = vector.extract_strided_slice %88 {offsets = [0, 1], sizes = [4, 9], strides = [1, 1]} : vector<4x35xf32> to vector<4x9xf32>
    %94 = arith.mulf %92, %93 : vector<4x9xf32>
    %cst_25 = arith.constant dense<0.000000e+00> : vector<4xf32>
    %95 = vector.multi_reduction <add>, %94, %cst_25 [1] : vector<4x9xf32> to vector<4xf32>
    %96 = vector.shape_cast %95 : vector<4xf32> to vector<4x1xf32>
    %97 = vector.extract_strided_slice %2 {offsets = [0, 10], sizes = [4, 9], strides = [1, 1]} : vector<4x44xf32> to vector<4x9xf32>
    %98 = vector.extract_strided_slice %88 {offsets = [0, 1], sizes = [4, 9], strides = [1, 1]} : vector<4x35xf32> to vector<4x9xf32>
    %99 = arith.mulf %97, %98 : vector<4x9xf32>
    %cst_26 = arith.constant dense<0.000000e+00> : vector<4xf32>
    %100 = vector.multi_reduction <add>, %99, %cst_26 [1] : vector<4x9xf32> to vector<4xf32>
    %101 = vector.shape_cast %100 : vector<4xf32> to vector<4x1xf32>
    %102 = vector.extract_strided_slice %2 {offsets = [0, 19], sizes = [4, 25], strides = [1, 1]} : vector<4x44xf32> to vector<4x25xf32>
    %103 = vector.extract_strided_slice %88 {offsets = [0, 10], sizes = [4, 25], strides = [1, 1]} : vector<4x35xf32> to vector<4x25xf32>
    %104 = arith.mulf %102, %103 : vector<4x25xf32>
    %cst_27 = arith.constant dense<0.000000e+00> : vector<4xf32>
    %105 = vector.multi_reduction <add>, %104, %cst_27 [1] : vector<4x25xf32> to vector<4xf32>
    %106 = vector.shape_cast %105 : vector<4xf32> to vector<4x1xf32>
    %107 = tpu.concatenate %91, %96, %101, %106 in 0 : vector<4x1xf32>, vector<4x1xf32>, vector<4x1xf32>, vector<4x1xf32> -> vector<16x1xf32>
    %cst_28 = arith.constant dense<0.000000e+00> : vector<8x1xf32>
    %108 = tpu.matmul %3, %107, %cst_28 {dimension_numbers = #tpu.dot_dimension_numbers<[1], [0], [0], [1], [0, 0, 1, 1], [], []>} : vector<8x16xf32>, vector<16x1xf32>, vector<8x1xf32> -> vector<8x1xf32>
    %109 = arith.negf %108 : vector<8x1xf32>
    %110 = math.exp %109 : vector<8x1xf32>
    %cst_29 = arith.constant 1.000000e+00 : f32
    %111 = vector.broadcast %cst_29 : f32 to vector<8x1xf32>
    %112 = arith.addf %111, %110 : vector<8x1xf32>
    %113 = arith.divf %111, %112 : vector<8x1xf32>
    %114 = vector.extract_strided_slice %63 {offsets = [0, 0], sizes = [8, 256], strides = [1, 1]} : vector<8x384xf32> to vector<8x256xf32>
    %115 = vector.broadcast %113 : vector<8x1xf32> to vector<8x256xf32>
    %116 = arith.mulf %114, %115 : vector<8x256xf32>
    %c1_30 = arith.constant 1 : index
    %c0_31 = arith.constant 0 : index
    %c0_32 = arith.constant 0 : index
    %117 = vector.load %arg6[%c1_30, %c0_31, %c0_32] : memref<2x8x256xf32, #tpu.memory_space<vmem>>, vector<1x8x256xf32>
    %118 = vector.shape_cast %117 : vector<1x8x256xf32> to vector<8x256xf32>
    %119 = vector.shape_cast %116 : vector<8x256xf32> to vector<1x8x256xf32>
    tpu.vector_store %arg6[%c1_30, %c0_31, %c0_32], %119 {strides = array<i32>} : memref<2x8x256xf32, #tpu.memory_space<vmem>>, vector<1x8x256xf32>,
    return
  }
  func.func @transform_0(%arg0: i32) -> (i32, i32, i32) {
    %c0_i32 = arith.constant 0 : i32
    %c0_i32_0 = arith.constant 0 : i32
    %c0_i32_1 = arith.constant 0 : i32
    return %arg0, %c0_i32, %c0_i32_0 : i32, i32, i32
  }
  func.func @transform_1(%arg0: i32) -> (i32, i32) {
    %c0_i32 = arith.constant 0 : i32
    %c0_i32_0 = arith.constant 0 : i32
    %c0_i32_1 = arith.constant 0 : i32
    return %c0_i32, %c0_i32_0 : i32, i32
  }
  func.func @transform_2(%arg0: i32) -> (i32, i32) {
    %c0_i32 = arith.constant 0 : i32
    %c0_i32_0 = arith.constant 0 : i32
    %c0_i32_1 = arith.constant 0 : i32
    return %c0_i32, %c0_i32_0 : i32, i32
  }
  func.func @transform_3(%arg0: i32) -> (i32, i32) {
    %c0_i32 = arith.constant 0 : i32
    %c0_i32_0 = arith.constant 0 : i32
    %c0_i32_1 = arith.constant 0 : i32
    return %c0_i32, %c0_i32_0 : i32, i32
  }
  func.func @transform_4(%arg0: i32) -> (i32, i32) {
    %c0_i32 = arith.constant 0 : i32
    %c0_i32_0 = arith.constant 0 : i32
    %c0_i32_1 = arith.constant 0 : i32
    return %c0_i32, %c0_i32_0 : i32, i32
  }
  func.func @transform_5(%arg0: i32) -> (i32, i32, i32) {
    %c0_i32 = arith.constant 0 : i32
    %c0_i32_0 = arith.constant 0 : i32
    %c0_i32_1 = arith.constant 0 : i32
    return %arg0, %c0_i32, %c0_i32_0 : i32, i32, i32
  }
}

</mosaic_0001>

<bundles_post_ra>
// kernel: mscam_v3.1
= control target key start
LH: loop header
LB: loop body
LE: loop exit
PB: predicated region body
PF: predicated region fallthrough
CT: control target
= control target key end

     0   :  { %vm62_vm0 = vcmask 64512   ;;  %s947_s9 = smov 127   ;;  %s949_s10 = smov 112   ;;  %vm186_vm1 = vcmask 1039360   ;;  %vm202_vm2 = vcmask 1031168   ;;  %vm218_vm3 = vcmask 916480   ;;  %s1546_s0 = inlined_call_operand.vmem [shape: f32[2,8,384], index: 0, kind: input, shape index: {}]   ;;  %s1547_s1 = inlined_call_operand.vmem [shape: f32[36,8], index: 1, kind: input, shape index: {}]   ;;  %s1548_s2 = inlined_call_operand.vmem [shape: f32[256,35], index: 2, kind: input, shape index: {}]   ;;  %s1549_s3 = inlined_call_operand.vmem [shape: f32[4,44], index: 3, kind: input, shape index: {}]   ;;  %s1550_s4 = inlined_call_operand.vmem [shape: f32[8,16], index: 4, kind: input, shape index: {}]   ;;  %s1551_s5 = inlined_call_operand.vmem [shape: f32[2,8,256], index: 5, kind: output, shape index: {}]  }
   0x1   :  { %v59_v0 = vld [vmem:[%s1546_s0] sm:$0xff]  ;;  %v60_v2 = vld [vmem:[%s1546_s0 + $0x8] sm:$0xff]  ;;  %v61_v3 = vld [vmem:[%s1546_s0 + $0x10] sm:$0xff]  ;;  %s950_s11 = smov 111   ;;  %s951_s12 = smov 110   ;;  %vm234_vm4 = vcmask 908288  }
   0x2   :  { %v995_v1 = vld [vmem:[%s1547_s1] sm:$0xff]  ;;  %93 = vmatpush.msra.mxu0 %v59_v0  ;;  %125 = vmatpush.msra.mxu1 %v60_v2  ;;  %v1012_v4 = vld [vmem:[%s1547_s1 + $0x8] sm:$0xff]  ;;  %v1023_v5 = vld [vmem:[%s1547_s1 + $0x10] sm:$0xff]  ;;  %s952_s13 = smov 96   ;;  %s953_s14 = smov 95   ;;  %vm250_vm5 = vcmask 900096  }
   0x3   :  { %864 = vmatmul.msk.f32.vlgmr.msra.gmra.mxu0 %vm62_vm0, %v995_v1  ;;  %869 = vmatmul.msk.f32.vlgmr.msra.gmra.mxu1 %vm62_vm0, %v995_v1  ;;  %v1034_v6 = vld [vmem:[%s1547_s1 + $0x18] sm:$0xff]  ;;  %v1045_v7 = vld [vmem:[%s1547_s1 + $0x20] sm:$0xf]  ;;  %s948_s1 = smov 126   ;;  %s954_s15 = smov 94   ;;  %v1106_v47 = vld [vmem:[%s1548_s2 + $0x70] sm:$0xff] }
   0x4   :  { %157 = vmatpush.msra.mxu2 %v61_v3  ;;  %v1100_v46 = vld [vmem:[%s1548_s2 + $0x78] sm:$0xff]  ;;  %v1112_v48 = vld [vmem:[%s1548_s2 + $0x68] sm:$0xff]  ;;  %v1118_v50 = vld [vmem:[%s1548_s2 + $0x60] sm:$0xff]  ;;  %vm266_vm6 = vcmask 785408   ;;  %vm282_vm7 = vcmask 777216   ;;  %vm298_vm8 = vcmask 769024  }
   0x5   :  { %874 = vmatmul.msk.f32.vlgmr.msra.gmra.mxu2 %vm62_vm0, %v995_v1  ;;  %345 = vmatpush.msra.mxu3 %v1100_v46  ;;  %v1128_v53 = vld [vmem:[%s1548_s2 + $0x58] sm:$0xff]  ;;  %v1139_v55 = vld [vmem:[%s1548_s2 + $0x50] sm:$0xff]  ;;  %v1151_v57 = vld [vmem:[%s1548_s2 + $0x48] sm:$0xff]  ;;  %s955_s27 = smov 9   ;;  %s957_s30 = smov 109  }
   0x6   :  { %v1134_v54 = vld [vmem:[%s1548_s2 + $0xf8] sm:$0xff]  ;;  %v1146_v56 = vld [vmem:[%s1548_s2 + $0xf0] sm:$0xff]  ;;  %v1160_v60 = vld [vmem:[%s1548_s2 + $0xe8] sm:$0xff] }
   0x7   :  { %346 = vmatpush.msra.mxu3 %v1106_v47  ;;  %365 = vmatpush.msrb.mxu0 %v1134_v54  ;;  %v1165_v61 = vld [vmem:[%s1548_s2 + $0x40] sm:$0xff]  ;;  %v1180_v3 = vld [vmem:[%s1548_s2 + $0x38] sm:$0xff] }
   0x8   :  { %v1175_v2 = vld [vmem:[%s1548_s2 + $0xe0] sm:$0xff] }
   0x9   :  { %347 = vmatpush.msra.mxu3 %v1112_v48  ;;  %366 = vmatpush.msrb.mxu0 %v1146_v56 }
   0xb   :  { %865 = vmatmul.msk.f32.gmra.mxu0 %vm62_vm0, %v1012_v4  ;;  %870 = vmatmul.msk.f32.gmra.mxu1 %vm62_vm0, %v1012_v4 }
   0xc   :  { %348 = vmatpush.msra.mxu3 %v1118_v50  ;;  %367 = vmatpush.msrb.mxu0 %v1160_v60 }
   0xd   :  { %875 = vmatmul.msk.f32.gmra.mxu2 %vm62_vm0, %v1012_v4 }
   0xe   :  { %349 = vmatpush.msra.mxu3 %v1128_v53  ;;  %368 = vmatpush.msrb.mxu0 %v1175_v2 }
  0x10   :  { %350 = vmatpush.msra.mxu3 %v1139_v55 }
  0x12   :  { %351 = vmatpush.msra.mxu3 %v1151_v57 }
  0x13   :  { %866 = vmatmul.msk.f32.gmra.mxu0 %vm62_vm0, %v1023_v5  ;;  %871 = vmatmul.msk.f32.gmra.mxu1 %vm62_vm0, %v1023_v5 }
  0x14   :  { %352 = vmatpush.msra.mxu3 %v1165_v61 }
  0x15   :  { %876 = vmatmul.msk.f32.gmra.mxu2 %vm62_vm0, %v1023_v5 }
  0x16   :  { %353 = vmatpush.msra.mxu3 %v1180_v3 }
  0x1b   :  { %867 = vmatmul.msk.f32.gmra.mxu0 %vm62_vm0, %v1034_v6  ;;  %872 = vmatmul.msk.f32.gmra.mxu1 %vm62_vm0, %v1034_v6 }
  0x1d   :  { %877 = vmatmul.msk.f32.gmra.mxu2 %vm62_vm0, %v1034_v6 }
  0x23   :  { %868 = vmatmul.msk.f32.gmra.mxu0 %vm62_vm0, %v1045_v7  ;;  %873 = vmatmul.msk.f32.gmra.mxu1 %vm62_vm0, %v1045_v7 }
  0x25   :  { %878 = vmatmul.msk.f32.gmra.mxu2 %vm62_vm0, %v1045_v7 }
  0x80   :  { %v1053_v8 = vpop.f32.mrf.mxu0  ;;  %v1056_v10 = vpop.f32.mrf.mxu1 }
  0x81   :  { %v177_v9 = vrot.slane %v1053_v8, 4  ;;  %v178_v11 = vrot.slane %v1056_v10, 4 }
  0x83   :  { %180 = vrot.lane.b32.xlu0 %v177_v9, %s947_s9 }
  0x88   :  { %v98_v12 = vpop.f32.mrf.mxu0  ;;  %v130_v14 = vpop.f32.mrf.mxu1 }
  0x89   :  { %196 = vrot.lane.b32.xlu1 %v98_v12, %s948_s1  ;;  %v209_v13 = vrot.slane %v98_v12, 4  ;;  %v159_v15 = vpop.f32.mrf.mxu2  ;;  %v210_v16 = vrot.slane %v130_v14, 4  ;;  %v1194_v12 = vld [vmem:[%s1548_s2 + $0x30] sm:$0xff] }
  0x8a   :  { %v179_v17 = vrot.slane %v159_v15, 4  ;;  %354 = vmatpush.msra.mxu3 %v1194_v12 }
  0x8b   :  { %182 = vrot.lane.b32.xlu0 %v178_v11, %s947_s9  ;;  %212 = vrot.lane.b32.xlu2 %v209_v13, %s949_s10  ;;  %v1201_v13 = vld [vmem:[%s1548_s2 + $0xd0] sm:$0xff] }
  0x90   :  { %v101_v18 = vpop.f32.mrf.mxu0  ;;  %v133_v20 = vpop.f32.mrf.mxu1 }
  0x91   :  { %198 = vrot.lane.b32.xlu1 %v130_v14, %s948_s1  ;;  %v162_v19 = vpop.f32.mrf.mxu2  ;;  %v241_v21 = vrot.slane %v101_v18, 4  ;;  %v242_v22 = vrot.slane %v133_v20, 4  ;;  %v1206_v14 = vld [vmem:[%s1548_s2 + $0x28] sm:$0xff] }
  0x92   :  { %v211_v23 = vrot.slane %v162_v19, 4  ;;  %355 = vmatpush.msra.mxu3 %v1206_v14 }
  0x93   :  { %184 = vrot.lane.b32.xlu0 %v179_v17, %s947_s9  ;;  %214 = vrot.lane.b32.xlu2 %v210_v16, %s949_s10 }
  0x98   :  { %v104_v24 = vpop.f32.mrf.mxu0  ;;  %v136_v26 = vpop.f32.mrf.mxu1 }
  0x99   :  { %228 = vrot.lane.b32.xlu1 %v101_v18, %s950_s11  ;;  %v165_v25 = vpop.f32.mrf.mxu2  ;;  %v273_v27 = vrot.slane %v104_v24, 4  ;;  %v274_v28 = vrot.slane %v136_v26, 4 }
  0x9a   :  { %v243_v29 = vrot.slane %v165_v25, 4 }
  0x9b   :  { %200 = vrot.lane.b32.xlu0 %v162_v19, %s948_s1  ;;  %230 = vrot.lane.b32.xlu2 %v133_v20, %s950_s11  ;;  %v1217_v19 = vld [vmem:[%s1548_s2 + $0xc8] sm:$0xff]  ;;  %v1222_v20 = vld [vmem:[%s1548_s2 + $0x20] sm:$0xff] }
  0x9c   :  { %356 = vmatpush.msra.mxu3 %v1222_v20 }
  0xa0   :  { %v107_v30 = vpop.f32.mrf.mxu0  ;;  %v139_v32 = vpop.f32.mrf.mxu1 }
  0xa1   :  { %244 = vrot.lane.b32.xlu1 %v241_v21, %s951_s12  ;;  %v168_v31 = vpop.f32.mrf.mxu2 }
  0xa2   :  { %v275_v33 = vrot.slane %v168_v31, 4 }
  0xa3   :  { %216 = vrot.lane.b32.xlu0 %v211_v23, %s949_s10  ;;  %246 = vrot.lane.b32.xlu2 %v242_v22, %s951_s12  ;;  %v1231_v22 = vld [vmem:[%s1548_s2 + $0x18] sm:$0xff]  ;;  %v1236_v23 = vld [vmem:[%s1548_s2 + $0xc0] sm:$0xff] }
  0xa4   :  { %357 = vmatpush.msra.mxu3 %v1231_v22 }
  0xa9   :  { %260 = vrot.lane.b32.xlu1 %v104_v24, %s952_s13  ;;  %v171_v34 = vpop.f32.mrf.mxu2 }
  0xab   :  { %232 = vrot.lane.b32.xlu0 %v165_v25, %s950_s11  ;;  %262 = vrot.lane.b32.xlu2 %v136_v26, %s952_s13  ;;  %v1241_v26 = vld [vmem:[%s1548_s2 + $0x10] sm:$0xff] }
  0xac   :  { %358 = vmatpush.msra.mxu3 %v1241_v26 }
  0xb1   :  { %276 = vrot.lane.b32.xlu1 %v273_v27, %s953_s14  ;;  %v1246_v27 = vld [vmem:[%s1548_s2 + $0xb8] sm:$0xff] }
  0xb3   :  { %248 = vrot.lane.b32.xlu0 %v243_v29, %s951_s12  ;;  %278 = vrot.lane.b32.xlu2 %v274_v28, %s953_s14 }
  0xb9   :  { %292 = vrot.lane.b32.xlu1 %v107_v30, %s954_s15 }
  0xbb   :  { %264 = vrot.lane.b32.xlu0 %v168_v31, %s952_s13  ;;  %294 = vrot.lane.b32.xlu2 %v139_v32, %s954_s15  ;;  %v1258_v31 = vld [vmem:[%s1548_s2 + $0x8] sm:$0xff]  ;;  %v1263_v32 = vld [vmem:[%s1548_s2 + $0xb0] sm:$0xff] }
  0xbc   :  { %359 = vmatpush.msra.mxu3 %v1258_v31 }
  0xc1   :  { %280 = vrot.lane.b32.xlu1 %v275_v33, %s953_s14 }
  0xc3   :  { %296 = vrot.lane.b32.xlu2 %v171_v34, %s954_s15 }
  0xe5   :  { %v213_v35 = vpop.permute.xlu2 %212 }
  0xed   :  { %v1083_v37 = vpop.permute.xlu2 %214 }
  0xee   :  { %v219_v15 = vsel %vm218_vm3, %v213_v35, %v1083_v37 }
  0xf5   :  { %v181_v36 = vpop.permute.xlu0 %180  ;;  %v1087_v40 = vpop.permute.xlu2 %230 }
  0xfb   :  { %v197_v38 = vpop.permute.xlu1 %196 }
  0xfd   :  { %v1085_v39 = vpop.permute.xlu0 %182  ;;  %v1093_v44 = vpop.permute.xlu2 %246 }
  0xfe   :  { %v187_v58 = vsel %vm186_vm1, %v181_v36, %v1085_v39 }
  0xff   :  { %v191_v63 = vadd.f32 %v187_v58, %v1053_v8  ;;  %v1189_v8 = vld [vmem:[%s1548_s2 + $0xd8] sm:$0xff] }
 0x100   :  { %369 = vmatpush.msrb.mxu0 %v1189_v8 }
 0x102   :  { %370 = vmatpush.msrb.mxu0 %v1201_v13 }
 0x103   :  { %v1089_v41 = vpop.permute.xlu1 %198 }
 0x104   :  { %v203_v62 = vsel %vm202_vm2, %v197_v38, %v1089_v41  ;;  %371 = vmatpush.msrb.mxu0 %v1217_v19 }
 0x105   :  { %v1091_v42 = vpop.permute.xlu0 %184  ;;  %v1123_v52 = vpop.permute.xlu2 %262  ;;  %v207_v9 = vadd.f32 %v203_v62, %v191_v63 }
 0x106   :  { %v188_v28 = vsel %vm186_vm1, %v1085_v39, %v1091_v42  ;;  %372 = vmatpush.msrb.mxu0 %v1236_v23  ;;  %v1276_v39 = vld [vmem:[%s1548_s2] sm:$0xff] }
 0x107   :  { %v223_v17 = vadd.f32 %v219_v15, %v207_v9  ;;  %v192_v35 = vadd.f32 %v188_v28, %v1056_v10  ;;  %360 = vmatpush.msra.mxu3 %v1276_v39  ;;  %v1309_v15 = vld [vmem:[%s1548_s2 + $0x90] sm:$0xff] }
 0x108   :  { %373 = vmatpush.msrb.mxu0 %v1246_v27 }
 0x10a   :  { %374 = vmatpush.msrb.mxu0 %v1263_v32 }
 0x10b   :  { %v229_v43 = vpop.permute.xlu1 %228 }
 0x10c   :  { %v235_v16 = vsel %vm234_vm4, %v229_v43, %v1087_v40 }
 0x10d   :  { %v1095_v45 = vpop.permute.xlu0 %200  ;;  %v1184_v11 = vpop.permute.xlu2 %278  ;;  %v239_v24 = vadd.f32 %v235_v16, %v223_v17 }
 0x10e   :  { %v204_v33 = vsel %vm202_vm2, %v1089_v41, %v1095_v45  ;;  %v1281_v41 = vld [vmem:[%s1548_s2 + $0xa8] sm:$0xff] }
 0x10f   :  { %v208_v10 = vadd.f32 %v204_v33, %v192_v35  ;;  %375 = vmatpush.msrb.mxu0 %v1281_v41 }
 0x113   :  { %v245_v49 = vpop.permute.xlu1 %244 }
 0x114   :  { %v251_v21 = vsel %vm250_vm5, %v245_v49, %v1093_v44 }
 0x115   :  { %v1121_v51 = vpop.permute.xlu0 %216  ;;  %v255_v30 = vadd.f32 %v251_v21, %v239_v24  ;;  %v295_v38 = vpop.permute.xlu2 %294 }
 0x116   :  { %v220_v42 = vsel %vm218_vm3, %v1083_v37, %v1121_v51  ;;  %v1296_v37 = vld [vmem:[%s1548_s2 + $0xa0] sm:$0xff]  ;;  %v1301_v51 = vld [vmem:[%s1548_s2 + $0x98] sm:$0xff] }
 0x117   :  { %376 = vmatpush.msrb.mxu0 %v1296_v37 }
 0x119   :  { %377 = vmatpush.msrb.mxu0 %v1301_v51 }
 0x11b   :  { %v261_v59 = vpop.permute.xlu1 %260  ;;  %378 = vmatpush.msrb.mxu0 %v1309_v15 }
 0x11c   :  { %v267_v29 = vsel %vm266_vm6, %v261_v59, %v1123_v52  ;;  %v224_v59 = vadd.f32 %v220_v42, %v208_v10 }
 0x11d   :  { %v233_v0 = vpop.permute.xlu0 %232  ;;  %v271_v36 = vadd.f32 %v267_v29, %v255_v30  ;;  %v297_v21 = vpop.permute.xlu2 %296 }
 0x11e   :  { %v236_v49 = vsel %vm234_vm4, %v1087_v40, %v233_v0  ;;  %v300_v29 = vsel %vm298_vm8, %v295_v38, %v297_v21  ;;  %v1380_v21 = vld [vmem:[%s1546_s0 + $0x18] sm:$0xff] }
 0x11f   :  { %v240_v0 = vadd.f32 %v236_v49, %v224_v59  ;;  %493 = vmatpush.msrb.mxu1 %v1380_v21 }
 0x120   :  { %886 = vmatmul.msk.f32.vlgmr.msrb.gmra.mxu1 %vm62_vm0, %v995_v1 }
 0x121   :  { %757 = vmatpush.msra.mxu1 %v1134_v54 }
 0x123   :  { %v277_v18 = vpop.permute.xlu1 %276  ;;  %758 = vmatpush.msra.mxu1 %v1146_v56 }
 0x124   :  { %v283_v34 = vsel %vm282_vm7, %v277_v18, %v1184_v11 }
 0x125   :  { %v249_v25 = vpop.permute.xlu0 %248  ;;  %v287_v43 = vadd.f32 %v283_v34, %v271_v36  ;;  %759 = vmatpush.msra.mxu1 %v1160_v60 }
 0x126   :  { %v252_v40 = vsel %vm250_vm5, %v1093_v44, %v249_v25  ;;  %v1317_v44 = vld [vmem:[%s1548_s2 + $0x88] sm:$0xff]  ;;  %v1323_v25 = vld [vmem:[%s1548_s2 + $0x80] sm:$0xff] }
 0x127   :  { %v256_v17 = vadd.f32 %v252_v40, %v240_v0  ;;  %379 = vmatpush.msrb.mxu0 %v1317_v44  ;;  %760 = vmatpush.msra.mxu1 %v1175_v2 }
 0x128   :  { %887 = vmatmul.msk.f32.gmra.mxu1 %vm62_vm0, %v1012_v4 }
 0x129   :  { %380 = vmatpush.msrb.mxu0 %v1323_v25  ;;  %761 = vmatpush.msra.mxu1 %v1189_v8 }
 0x12b   :  { %v293_v45 = vpop.permute.xlu1 %292  ;;  %737 = vmatpush.msra.mxu0 %v1100_v46  ;;  %762 = vmatpush.msra.mxu1 %v1201_v13 }
 0x12c   :  { %v299_v58 = vsel %vm298_vm8, %v293_v45, %v295_v38 }
 0x12d   :  { %v303_v62 = vadd.f32 %v299_v58, %v287_v43  ;;  %v265_v63 = vpop.permute.xlu0 %264  ;;  %738 = vmatpush.msra.mxu0 %v1106_v47  ;;  %763 = vmatpush.msra.mxu1 %v1217_v19 }
 0x12e   :  { %v268_v16 = vsel %vm266_vm6, %v1123_v52, %v265_v63 }
 0x12f   :  { %v879_v9 = vmul.f32 -1.442695, %v303_v62  ;;  %v272_v18 = vadd.f32 %v268_v16, %v256_v17  ;;  %739 = vmatpush.msra.mxu0 %v1112_v48  ;;  %764 = vmatpush.msra.mxu1 %v1236_v23 }
 0x130   :  { %888 = vmatmul.msk.f32.gmra.mxu1 %vm62_vm0, %v1023_v5 }
 0x131   :  { %921 = vpow2.f32 %v879_v9  ;;  %740 = vmatpush.msra.mxu0 %v1118_v50  ;;  %765 = vmatpush.msra.mxu1 %v1246_v27 }
 0x133   :  { %v281_v24 = vpop.permute.xlu1 %280  ;;  %741 = vmatpush.msra.mxu0 %v1128_v53  ;;  %766 = vmatpush.msra.mxu1 %v1263_v32 }
 0x134   :  { %v284_v52 = vsel %vm282_vm7, %v1184_v11, %v281_v24 }
 0x135   :  { %v288_v28 = vadd.f32 %v284_v52, %v272_v18  ;;  %742 = vmatpush.msra.mxu0 %v1139_v55  ;;  %767 = vmatpush.msra.mxu1 %v1281_v41 }
 0x137   :  { %v922_v30 = vpop.eup %921  ;;  %v304_v33 = vadd.f32 %v300_v29, %v288_v28  ;;  %743 = vmatpush.msra.mxu0 %v1151_v57  ;;  %768 = vmatpush.msra.mxu1 %v1296_v37 }
 0x138   :  { %v311_v34 = vadd.f32 1.0, %v922_v30  ;;  %889 = vmatmul.msk.f32.gmra.mxu1 %vm62_vm0, %v1034_v6 }
 0x139   :  { %v880_v35 = vmul.f32 -1.442695, %v304_v33  ;;  %744 = vmatpush.msra.mxu0 %v1165_v61  ;;  %769 = vmatpush.msra.mxu1 %v1301_v51 }
 0x13a   :  { %923 = vrcp.f32 %v311_v34  ;;  %v324_v46 = vand.u32 2147483648, %v311_v34  ;;  %v322_v43 = vand.u32 2147483647, %v311_v34  ;;  %vm318_vm10 = vweird.f32 %v311_v34 }
 0x13b   :  { %925 = vpow2.f32 %v880_v35  ;;  %745 = vmatpush.msra.mxu0 %v1180_v3  ;;  %770 = vmatpush.msra.mxu1 %v1309_v15  ;;  %v1429_v35 = vld [vmem:[%s1550_s4] sm:$0xff] }
 0x13c   :  { %v325_v50 = vor.u32 1.1754944e-38, %v324_v46  ;;  %vm323_vm12 = vcmp.eq.f32.partialorder %v322_v43, 8.507059e+37 }
 0x13d   :  { %746 = vmatpush.msra.mxu0 %v1194_v12  ;;  %771 = vmatpush.msra.mxu1 %v1317_v44 }
 0x13f   :  { %747 = vmatpush.msra.mxu0 %v1206_v14  ;;  %772 = vmatpush.msra.mxu1 %v1323_v25 }
 0x140   :  { %v924_v11 = vpop.eup %923  ;;  %890 = vmatmul.msk.f32.gmra.mxu1 %vm62_vm0, %v1045_v7 }
 0x141   :  { %v926_v36 = vpop.eup %925  ;;  %v314_v38 = vmul.f32 %v924_v11, %v311_v34  ;;  %vm319_vm9 = vweird.f32 %v924_v11  ;;  %748 = vmatpush.msra.mxu0 %v1222_v20 }
 0x142   :  { %v312_v42 = vadd.f32 1.0, %v926_v36  ;;  %vm320_vm11 = vmor %vm318_vm10, %vm319_vm9  ;;  %vm390_vm10 = vcmask 68608   ;;  %v885_v36 = vld [vmem:[%s1546_s0 + $0x28] sm:$0xff] }
 0x143   :  { %v315_v10 = vsub.f32 1.0, %v314_v38  ;;  %749 = vmatpush.msra.mxu0 %v1231_v22  ;;  %v1349_v22 = vld [vmem:[%s1549_s3] sm:$0xf]  ;;  %s956_s3 = smov 118  }
 0x144   :  { %927 = vrcp.f32 %v312_v42  ;;  %v339_v61 = vand.u32 2147483648, %v312_v42  ;;  %v337_v3 = vand.u32 2147483647, %v312_v42  ;;  %vm333_vm14 = vweird.f32 %v312_v42 }
 0x145   :  { %v316_v47 = vmul.f32 %v924_v11, %v315_v10  ;;  %750 = vmatpush.msra.mxu0 %v1241_v26 }
 0x146   :  { %v340_v12 = vor.u32 1.1754944e-38, %v339_v61  ;;  %vm338_vm9 = vcmp.eq.f32.partialorder %v337_v3, 8.507059e+37 }
 0x147   :  { %v317_v48 = vadd.f32 %v924_v11, %v316_v47  ;;  %751 = vmatpush.msra.mxu0 %v1258_v31  ;;  %v1360_v31 = vld [vmem:[%s1546_s0 + $0x20] sm:$0xff] }
 0x148   :  { %525 = vmatpush.msrb.mxu2 %v1360_v31 }
 0x149   :  { %v321_v53 = vsel %vm320_vm11, %v924_v11, %v317_v48  ;;  %752 = vmatpush.msra.mxu0 %v1276_v39  ;;  %891 = vmatmul.msk.f32.vlgmr.msrb.gmra.mxu2 %vm62_vm0, %v995_v1  ;;  %vm409_vm11 = vcmask 199680  }
 0x14a   :  { %v928_v55 = vpop.eup %927  ;;  %v326_v45 = vsel %vm323_vm12, %v325_v50, %v321_v53  ;;  %vm419_vm12 = vcmask 1043456  }
 0x14b   :  { %v343_v57 = vmul.f32 %v326_v45, %v303_v62  ;;  %v329_v49 = vmul.f32 %v928_v55, %v312_v42  ;;  %vm334_vm13 = vweird.f32 %v928_v55 }
 0x14c   :  { %vm335_vm15 = vmor %vm333_vm14, %vm334_vm13  ;;  %vm422_vm13 = vcmask 130048  }
 0x14d   :  { %361 = vmatmul.f32.vlgmr.msra.gmra.mxu3 %v343_v57  ;;  %v330_v58 = vsub.f32 1.0, %v329_v49 }
 0x14f   :  { %v331_v59 = vmul.f32 %v928_v55, %v330_v58 }
 0x151   :  { %v332_v63 = vadd.f32 %v928_v55, %v331_v59  ;;  %892 = vmatmul.msk.f32.gmra.mxu2 %vm62_vm0, %v1012_v4 }
 0x153   :  { %v336_v62 = vsel %vm335_vm15, %v928_v55, %v332_v63 }
 0x154   :  { %v341_v14 = vsel %vm338_vm9, %v340_v12, %v336_v62 }
 0x155   :  { %v344_v40 = vmul.f32 %v341_v14, %v304_v33 }
 0x157   :  { %381 = vmatmul.f32.vlgmr.msrb.gmra.mxu0 %v344_v40 }
 0x159   :  { %893 = vmatmul.msk.f32.gmra.mxu2 %vm62_vm0, %v1023_v5 }
 0x161   :  { %894 = vmatmul.msk.f32.gmra.mxu2 %vm62_vm0, %v1034_v6 }
 0x169   :  { %895 = vmatmul.msk.f32.gmra.mxu2 %vm62_vm0, %v1045_v7 }
 0x19d   :  { %v495_v27 = vpop.f32.mrf.mxu1 }
 0x19e   :  { %v577_v32 = vrot.slane %v495_v27, 4 }
 0x1a5   :  { %v498_v51 = vpop.f32.mrf.mxu1 }
 0x1a6   :  { %v607_v15 = vrot.slane %v498_v51, 4 }
 0x1ad   :  { %v501_v52 = vpop.f32.mrf.mxu1 }
 0x1ae   :  { %v637_v38 = vrot.slane %v501_v52, 4 }
 0x1b5   :  { %v504_v10 = vpop.f32.mrf.mxu1 }
 0x1b6   :  { %v667_v46 = vrot.slane %v504_v10, 4 }
 0x1bd   :  { %v507_v47 = vpop.f32.mrf.mxu1 }
 0x1cc   :  { %v1411_v8 = vpop.f32.mrf.mxu2 }
 0x1cd   :  { %v578_v13 = vrot.slane %v1411_v8, 4 }
 0x1d0   :  { %v362_v20 = vpop.f32.mrf.mxu3 }
 0x1d4   :  { %v382_v0 = vpop.f32.mrf.mxu0  ;;  %v530_v19 = vpop.f32.mrf.mxu2 }
 0x1d5   :  { %v383_v9 = vadd.f32 %v382_v0, %v362_v20  ;;  %v608_v23 = vrot.slane %v530_v19, 4 }
 0x1d7   :  { %v1352_v26 = vmul.f32 %v383_v9, %v1349_v22  ;;  %395 = vrot.lane.b32.xlu0 %v383_v9, %s955_s27 }
 0x1d9   :  { %387 = vrot.lane.b32.xlu2 %v1352_v26, %s947_s9 }
 0x1dc   :  { %v533_v41 = vpop.f32.mrf.mxu2 }
 0x1dd   :  { %v638_v37 = vrot.slane %v533_v41, 4 }
 0x1e4   :  { %v536_v44 = vpop.f32.mrf.mxu2 }
 0x1e5   :  { %v668_v24 = vrot.slane %v536_v44, 4 }
 0x1ec   :  { %v539_v42 = vpop.f32.mrf.mxu2 }
 0x233   :  { %v388_v39 = vpop.permute.xlu2 %387 }
 0x234   :  { %v391_v16 = vsel %vm390_vm10, %v388_v39, 0.0 }
 0x235   :  { %392 = vadd.xlane.f32.xlu2 %v391_v16 }
 0x249   :  { %v396_v17 = vpop.permute.xlu0 %395 }
 0x24a   :  { %v398_v18 = vmul.f32 %v396_v17, %v1349_v22 }
 0x24c   :  { %400 = vrot.lane.b32.xlu0 %v398_v18, %s956_s3  ;;  %406 = vrot.lane.b32.xlu1 %v398_v18, %s957_s30 }
 0x24d   :  { %580 = vrot.lane.b32.xlu2 %v577_v32, %s947_s9 }
 0x255   :  { %595 = vrot.lane.b32.xlu2 %v498_v51, %s948_s1 }
 0x25d   :  { %610 = vrot.lane.b32.xlu2 %v607_v15, %s949_s10 }
 0x265   :  { %625 = vrot.lane.b32.xlu2 %v501_v52, %s950_s11 }
 0x26d   :  { %640 = vrot.lane.b32.xlu2 %v637_v38, %s951_s12 }
 0x275   :  { %655 = vrot.lane.b32.xlu2 %v504_v10, %s952_s13 }
 0x27d   :  { %670 = vrot.lane.b32.xlu2 %v667_v46, %s953_s14 }
 0x285   :  { %685 = vrot.lane.b32.xlu2 %v507_v47, %s954_s15 }
 0x2a8   :  { %v393_v25 = vpop.xlane.xlu2 %392 }
 0x2a9   :  { %v414_v29 = vrot.slane %v393_v25, 4 }
 0x2ab   :  { %v420_v11 = vsel %vm419_vm12, %v1352_v26, %v414_v29 }
 0x2b0   :  { %v581_v43 = vpop.permute.xlu2 %580 }
 0x2be   :  { %v401_v54 = vpop.permute.xlu0 %400  ;;  %v407_v56 = vpop.permute.xlu1 %406 }
 0x2bf   :  { %v403_v60 = vsel %vm390_vm10, %v401_v54, 0.0  ;;  %v410_v2 = vsel %vm409_vm11, %v407_v56, 0.0 }
 0x2c0   :  { %404 = vadd.xlane.f32.xlu0 %v403_v60  ;;  %411 = vadd.xlane.f32.xlu1 %v410_v2 }
 0x2d9   :  { %582 = vrot.lane.b32.xlu1 %v578_v13, %s947_s9 }
 0x2e1   :  { %597 = vrot.lane.b32.xlu1 %v530_v19, %s948_s1 }
 0x2e9   :  { %612 = vrot.lane.b32.xlu1 %v608_v23, %s949_s10 }
 0x2f1   :  { %627 = vrot.lane.b32.xlu1 %v533_v41, %s950_s11 }
 0x2f9   :  { %642 = vrot.lane.b32.xlu1 %v638_v37, %s951_s12 }
 0x301   :  { %657 = vrot.lane.b32.xlu1 %v536_v44, %s952_s13 }
 0x309   :  { %672 = vrot.lane.b32.xlu1 %v668_v24, %s953_s14 }
 0x311   :  { %687 = vrot.lane.b32.xlu1 %v539_v42, %s954_s15 }
 0x333   :  { %v412_v28 = vpop.xlane.xlu1 %411  ;;  %v405_v33 = vpop.xlane.xlu0 %404 }
 0x334   :  { %v417_v30 = vrot.slane %v412_v28, 4 }
 0x336   :  { %v421_v34 = vsel %vm419_vm12, %v405_v33, %v417_v30 }
 0x337   :  { %440 = vmatpush.msrb.mxu3 %v421_v34 }
 0x339   :  { %441 = vmatpush.msrb.mxu3 %v420_v11 }
 0x33a   :  { %881 = vmatmul.msk.f32.vlgmr.msrb.gmra.mxu3 %vm422_vm13, %v1429_v35 }
 0x33b   :  { %557 = vmatpush.msra.mxu3 %v885_v36 }
 0x342   :  { %896 = vmatmul.msk.f32.vlgmr.msra.gmra.mxu3 %vm62_vm0, %v995_v1 }
 0x34a   :  { %897 = vmatmul.msk.f32.gmra.mxu3 %vm62_vm0, %v1012_v4  ;;  %v596_v4 = vpop.permute.xlu2 %595 }
 0x34b   :  { %v1453_v1 = vpop.permute.xlu1 %582 }
 0x34c   :  { %v586_v45 = vsel %vm186_vm1, %v581_v43, %v1453_v1 }
 0x352   :  { %898 = vmatmul.msk.f32.gmra.mxu3 %vm62_vm0, %v1023_v5  ;;  %v611_v53 = vpop.permute.xlu2 %610 }
 0x353   :  { %v1455_v48 = vpop.permute.xlu1 %597 }
 0x35a   :  { %899 = vmatmul.msk.f32.gmra.mxu3 %vm62_vm0, %v1034_v6  ;;  %v626_v5 = vpop.permute.xlu2 %625  ;;  %v590_v6 = vadd.f32 %v586_v45, %v495_v27 }
 0x35b   :  { %v1457_v50 = vpop.permute.xlu1 %612 }
 0x35c   :  { %v616_v61 = vsel %vm218_vm3, %v611_v53, %v1457_v50 }
 0x362   :  { %900 = vmatmul.msk.f32.gmra.mxu3 %vm62_vm0, %v1045_v7  ;;  %v641_v49 = vpop.permute.xlu2 %640  ;;  %v601_v7 = vsel %vm202_vm2, %v596_v4, %v1455_v48 }
 0x363   :  { %v1459_v55 = vpop.permute.xlu1 %627  ;;  %v605_v58 = vadd.f32 %v601_v7, %v590_v6 }
 0x364   :  { %v631_v12 = vsel %vm234_vm4, %v626_v5, %v1459_v55 }
 0x365   :  { %v620_v59 = vadd.f32 %v616_v61, %v605_v58 }
 0x367   :  { %v635_v62 = vadd.f32 %v631_v12, %v620_v59 }
 0x36a   :  { %v656_v63 = vpop.permute.xlu2 %655 }
 0x36b   :  { %v1463_v57 = vpop.permute.xlu1 %642 }
 0x36c   :  { %v646_v14 = vsel %vm250_vm5, %v641_v49, %v1463_v57 }
 0x36d   :  { %v650_v40 = vadd.f32 %v646_v14, %v635_v62 }
 0x372   :  { %v671_v0 = vpop.permute.xlu2 %670 }
 0x373   :  { %v1469_v3 = vpop.permute.xlu1 %657 }
 0x374   :  { %v661_v9 = vsel %vm266_vm6, %v656_v63, %v1469_v3 }
 0x375   :  { %v665_v39 = vadd.f32 %v661_v9, %v650_v40 }
 0x37a   :  { %v686_v18 = vpop.permute.xlu2 %685 }
 0x37b   :  { %v1475_v20 = vpop.permute.xlu1 %672 }
 0x37c   :  { %v676_v26 = vsel %vm282_vm7, %v671_v0, %v1475_v20 }
 0x37d   :  { %v680_v16 = vadd.f32 %v676_v26, %v665_v39 }
 0x383   :  { %v1481_v17 = vpop.permute.xlu1 %687 }
 0x384   :  { %v691_v54 = vsel %vm298_vm8, %v686_v18, %v1481_v17 }
 0x385   :  { %v695_v56 = vadd.f32 %v691_v54, %v680_v16 }
 0x387   :  { %v901_v60 = vmul.f32 -1.442695, %v695_v56 }
 0x389   :  { %929 = vpow2.f32 %v901_v60 }
 0x38f   :  { %v930_v2 = vpop.eup %929 }
 0x390   :  { %v703_v13 = vadd.f32 1.0, %v930_v2 }
 0x392   :  { %931 = vrcp.f32 %v703_v13  ;;  %vm710_vm0 = vweird.f32 %v703_v13  ;;  %v716_v41 = vand.u32 2147483648, %v703_v13  ;;  %v714_v15 = vand.u32 2147483647, %v703_v13 }
 0x394   :  { %v717_v24 = vor.u32 1.1754944e-38, %v716_v41  ;;  %vm715_vm9 = vcmp.eq.f32.partialorder %v714_v15, 8.507059e+37 }
 0x398   :  { %v932_v23 = vpop.eup %931 }
 0x399   :  { %v706_v27 = vmul.f32 %v932_v23, %v703_v13  ;;  %vm711_vm14 = vweird.f32 %v932_v23 }
 0x39a   :  { %vm712_vm15 = vmor %vm710_vm0, %vm711_vm14 }
 0x39b   :  { %v707_v51 = vsub.f32 1.0, %v706_v27 }
 0x39d   :  { %v708_v44 = vmul.f32 %v932_v23, %v707_v51 }
 0x39f   :  { %v709_v25 = vadd.f32 %v932_v23, %v708_v44  ;;  %v958_v44 = vmov 0  }
 0x3a0   :  { %919 = vset.pattern.permute.xlu1 %v958_v44  ;;  %920 = vset.pattern.permute.xlu0 %v958_v44 }
 0x3a1   :  { %v713_v52 = vsel %vm712_vm15, %v932_v23, %v709_v25 }
 0x3a2   :  { %v718_v28 = vsel %vm715_vm9, %v717_v24, %v713_v52 }
 0x3a3   :  { %v735_v30 = vmul.f32 %v718_v28, %v695_v56 }
 0x3a5   :  { %753 = vmatmul.f32.vlgmr.msra.gmra.mxu0 %v735_v30 }
 0x3bd   :  { %v1485_v19 = vpop.f32.mrf.mxu3 }
 0x3be   :  { %v882_v52 = vmul.f32 -1.442695, %v1485_v19 }
 0x3c5   :  { %v559_v32 = vpop.f32.mrf.mxu3 }
 0x3c6   :  { %v579_v37 = vrot.slane %v559_v32, 4 }
 0x3c8   :  { %584 = vrot.lane.b32.xlu0 %v579_v37, %s947_s9 }
 0x3cd   :  { %v562_v29 = vpop.f32.mrf.mxu3 }
 0x3ce   :  { %v609_v33 = vrot.slane %v562_v29, 4 }
 0x3d0   :  { %599 = vrot.lane.b32.xlu0 %v562_v29, %s948_s1 }
 0x3d5   :  { %v565_v34 = vpop.f32.mrf.mxu3 }
 0x3d6   :  { %v639_v11 = vrot.slane %v565_v34, 4 }
 0x3d8   :  { %614 = vrot.lane.b32.xlu0 %v609_v33, %s949_s10 }
 0x3dd   :  { %v568_v36 = vpop.f32.mrf.mxu3 }
 0x3de   :  { %v669_v38 = vrot.slane %v568_v36, 4 }
 0x3e0   :  { %629 = vrot.lane.b32.xlu0 %v565_v34, %s950_s11 }
 0x3e5   :  { %v571_v42 = vpop.f32.mrf.mxu3 }
 0x3e8   :  { %644 = vrot.lane.b32.xlu0 %v639_v11, %s951_s12 }
 0x3f0   :  { %659 = vrot.lane.b32.xlu0 %v568_v36, %s952_s13 }
 0x3f8   :  { %674 = vrot.lane.b32.xlu0 %v669_v38, %s953_s14 }
 0x400   :  { %689 = vrot.lane.b32.xlu0 %v571_v42, %s954_s15 }
 0x422   :  { %v754_v13 = vpop.f32.mrf.mxu0 }
 0x43a   :  { %v585_v10 = vpop.permute.xlu0 %584 }
 0x43b   :  { %v587_v5 = vsel %vm186_vm1, %v1453_v1, %v585_v10 }
 0x43c   :  { %v591_v6 = vadd.f32 %v587_v5, %v1411_v8 }
 0x442   :  { %v600_v46 = vpop.permute.xlu0 %599 }
 0x443   :  { %v602_v45 = vsel %vm202_vm2, %v1455_v48, %v600_v46 }
 0x444   :  { %v606_v7 = vadd.f32 %v602_v45, %v591_v6 }
 0x44a   :  { %v615_v47 = vpop.permute.xlu0 %614 }
 0x44b   :  { %v617_v49 = vsel %vm218_vm3, %v1457_v50, %v615_v47 }
 0x44c   :  { %v621_v61 = vadd.f32 %v617_v49, %v606_v7 }
 0x452   :  { %v630_v43 = vpop.permute.xlu0 %629 }
 0x453   :  { %v632_v58 = vsel %vm234_vm4, %v1459_v55, %v630_v43 }
 0x454   :  { %v636_v12 = vadd.f32 %v632_v58, %v621_v61  ;;  %v945_v58 = vld [vmem:[%s1546_s0] sm:$0xff] }
 0x45a   :  { %v645_v4 = vpop.permute.xlu0 %644 }
 0x45b   :  { %v647_v63 = vsel %vm250_vm5, %v1463_v57, %v645_v4 }
 0x45c   :  { %v651_v62 = vadd.f32 %v647_v63, %v636_v12 }
 0x462   :  { %v660_v53 = vpop.permute.xlu0 %659 }
 0x463   :  { %v662_v1 = vsel %vm266_vm6, %v1469_v3, %v660_v53 }
 0x464   :  { %v666_v48 = vadd.f32 %v662_v1, %v651_v62 }
 0x46a   :  { %v675_v59 = vpop.permute.xlu0 %674 }
 0x46b   :  { %v677_v8 = vsel %vm282_vm7, %v1475_v20, %v675_v59  ;;  %v946_v59 = vld [vmem:[%s1546_s0 + $0x8] sm:$0xff] }
 0x46c   :  { %v681_v14 = vadd.f32 %v677_v8, %v666_v48 }
 0x472   :  { %v690_v50 = vpop.permute.xlu0 %689 }
 0x473   :  { %v692_v40 = vsel %vm298_vm8, %v1481_v17, %v690_v50 }
 0x474   :  { %v696_v55 = vadd.f32 %v692_v40, %v681_v14 }
 0x476   :  { %v902_v0 = vmul.f32 -1.442695, %v696_v55 }
 0x478   :  { %933 = vpow2.f32 %v902_v0 }
 0x47e   :  { %v934_v9 = vpop.eup %933 }
 0x47f   :  { %v704_v26 = vadd.f32 1.0, %v934_v9 }
 0x481   :  { %935 = vrcp.f32 %v704_v26  ;;  %v731_v3 = vand.u32 2147483648, %v704_v26  ;;  %v729_v54 = vand.u32 2147483647, %v704_v26  ;;  %vm725_vm2 = vweird.f32 %v704_v26 }
 0x482   :  { %937 = vpow2.f32 %v882_v52 }
 0x483   :  { %v732_v56 = vor.u32 1.1754944e-38, %v731_v3  ;;  %vm730_vm4 = vcmp.eq.f32.partialorder %v729_v54, 8.507059e+37 }
 0x487   :  { %v936_v57 = vpop.eup %935 }
 0x488   :  { %v721_v39 = vmul.f32 %v936_v57, %v704_v26  ;;  %vm726_vm1 = vweird.f32 %v936_v57  ;;  %v938_v28 = vpop.eup %937 }
 0x489   :  { %vm727_vm3 = vmor %vm725_vm2, %vm726_vm1 }
 0x48a   :  { %v722_v16 = vsub.f32 1.0, %v721_v39 }
 0x48c   :  { %v723_v18 = vmul.f32 %v936_v57, %v722_v16 }
 0x48e   :  { %v724_v20 = vadd.f32 %v936_v57, %v723_v18 }
 0x490   :  { %v728_v60 = vsel %vm727_vm3, %v936_v57, %v724_v20 }
 0x491   :  { %v733_v17 = vsel %vm730_vm4, %v732_v56, %v728_v60 }
 0x492   :  { %v736_v2 = vmul.f32 %v733_v17, %v696_v55 }
 0x494   :  { %773 = vmatmul.f32.vlgmr.msra.gmra.mxu1 %v736_v2 }
 0x511   :  { %v774_v23 = vpop.f32.mrf.mxu1 }
 0x512   :  { %v775_v27 = vadd.f32 %v774_v23, %v754_v13 }
 0x514   :  { %v777_v32 = vmul.f32 %v775_v27, %v1349_v22  ;;  %786 = vrot.lane.b32.xlu2 %v775_v27, %s955_s27 }
 0x516   :  { %779 = vrot.lane.b32.xlu0 %v777_v32, %s947_s9 }
 0x56e   :  { %v787_v41 = vpop.permute.xlu2 %786 }
 0x56f   :  { %v789_v37 = vmul.f32 %v787_v41, %v1349_v22  ;;  %v449_v22 = vadd.f32 1.0, %v938_v28 }
 0x571   :  { %791 = vrot.lane.b32.xlu2 %v789_v37, %s956_s3  ;;  %797 = vrot.lane.b32.xlu1 %v789_v37, %s957_s30  ;;  %939 = vrcp.f32 %v449_v22  ;;  %v461_v42 = vand.u32 2147483648, %v449_v22  ;;  %vm455_vm6 = vweird.f32 %v449_v22  ;;  %v459_v10 = vand.u32 2147483647, %v449_v22 }
 0x573   :  { %v462_v19 = vor.u32 1.1754944e-38, %v461_v42  ;;  %vm460_vm8 = vcmp.eq.f32.partialorder %v459_v10, 8.507059e+37 }
 0x577   :  { %v940_v33 = vpop.eup %939 }
 0x578   :  { %v451_v34 = vmul.f32 %v940_v33, %v449_v22  ;;  %vm456_vm5 = vweird.f32 %v940_v33 }
 0x579   :  { %vm457_vm7 = vmor %vm455_vm6, %vm456_vm5 }
 0x57a   :  { %v452_v11 = vsub.f32 1.0, %v451_v34 }
 0x57c   :  { %v453_v36 = vmul.f32 %v940_v33, %v452_v11 }
 0x57e   :  { %v454_v38 = vadd.f32 %v940_v33, %v453_v36 }
 0x580   :  { %v458_v46 = vsel %vm457_vm7, %v940_v33, %v454_v38 }
 0x581   :  { %v463_v47 = vsel %vm460_vm8, %v462_v19, %v458_v46 }
 0x588   :  { %v780_v51 = vpop.permute.xlu0 %779 }
 0x589   :  { %v782_v15 = vsel %vm390_vm10, %v780_v51, 0.0 }
 0x58a   :  { %783 = vadd.xlane.f32.xlu0 %v782_v15 }
 0x5cb   :  { %v792_v24 = vpop.permute.xlu2 %791 }
 0x5cc   :  { %v794_v25 = vsel %vm390_vm10, %v792_v24, 0.0 }
 0x5cd   :  { %795 = vadd.xlane.f32.xlu2 %v794_v25 }
 0x5e3   :  { %v798_v29 = vpop.permute.xlu1 %797 }
 0x5e4   :  { %v800_v30 = vsel %vm409_vm11, %v798_v29, 0.0 }
 0x5e5   :  { %801 = vadd.xlane.f32.xlu1 %v800_v30 }
 0x5fd   :  { %v784_v43 = vpop.xlane.xlu0 %783 }
 0x5fe   :  { %467 = vperm.xlu1 %919, %v463_v47   ;;  %v804_v53 = vrot.slane %v784_v43, 4 }
 0x600   :  { %v809_v49 = vsel %vm419_vm12, %v777_v32, %v804_v53 }
 0x640   :  { %v796_v45 = vpop.xlane.xlu2 %795 }
 0x658   :  { %v802_v4 = vpop.xlane.xlu1 %801 }
 0x659   :  { %v807_v5 = vrot.slane %v802_v4, 4 }
 0x65b   :  { %v810_v6 = vsel %vm419_vm12, %v796_v45, %v807_v5 }
 0x65c   :  { %825 = vmatpush.msrb.mxu0 %v810_v6 }
 0x65e   :  { %826 = vmatpush.msrb.mxu0 %v809_v49 }
 0x65f   :  { %903 = vmatmul.msk.f32.vlgmr.msrb.gmra.mxu0 %vm422_vm13, %v1429_v35 }
 0x670   :  { %v468_v7 = vpop.permute.xlu1 %467 }
 0x671   :  { %v470_v61 = vmul.f32 %v945_v58, %v468_v7  ;;  %v471_v63 = vmul.f32 %v946_v59, %v468_v7 }
 0x673   :  { %472 = vst [vmem:[%s1551_s5] sm:$0xff] %v470_v61 }
 0x674   :  { %473 = vst [vmem:[%s1551_s5 + $0x8] sm:$0xff] %v471_v63 }
 0x6dc   :  { %v828_v35 = vpop.f32.mrf.mxu0 }
 0x6dd   :  { %v904_v12 = vmul.f32 -1.442695, %v828_v35 }
 0x6df   :  { %941 = vpow2.f32 %v904_v12 }
 0x6e5   :  { %v942_v1 = vpop.eup %941 }
 0x6e6   :  { %v834_v62 = vadd.f32 1.0, %v942_v1 }
 0x6e8   :  { %943 = vrcp.f32 %v834_v62  ;;  %v846_v50 = vand.u32 2147483648, %v834_v62  ;;  %v844_v55 = vand.u32 2147483647, %v834_v62  ;;  %vm840_vm11 = vweird.f32 %v834_v62 }
 0x6ea   :  { %v847_v9 = vor.u32 1.1754944e-38, %v846_v50  ;;  %vm845_vm13 = vcmp.eq.f32.partialorder %v844_v55, 8.507059e+37 }
 0x6ee   :  { %v944_v8 = vpop.eup %943 }
 0x6ef   :  { %v836_v48 = vmul.f32 %v944_v8, %v834_v62  ;;  %vm841_vm10 = vweird.f32 %v944_v8 }
 0x6f0   :  { %vm842_vm12 = vmor %vm840_vm11, %vm841_vm10 }
 0x6f1   :  { %v837_v14 = vsub.f32 1.0, %v836_v48 }
 0x6f3   :  { %v838_v40 = vmul.f32 %v944_v8, %v837_v14 }
 0x6f5   :  { %v839_v0 = vadd.f32 %v944_v8, %v838_v40 }
 0x6f7   :  { %v843_v26 = vsel %vm842_vm12, %v944_v8, %v839_v0 }
 0x6f8   :  { %v848_v57 = vsel %vm845_vm13, %v847_v9, %v843_v26 }
 0x6f9   :  { %852 = vperm.xlu0 %920, %v848_v57  }
 0x76b   :  { %v853_v39 = vpop.permute.xlu0 %852 }
 0x76c   :  { %v855_v16 = vmul.f32 %v1380_v21, %v853_v39  ;;  %v856_v3 = vmul.f32 %v1360_v31, %v853_v39 }
 0x76e   :  { %905 = vst [vmem:[%s1551_s5 + $0x10] sm:$0xff] %v855_v16 }
 0x76f   :  { %906 = vst [vmem:[%s1551_s5 + $0x18] sm:$0xff] %v856_v3 }

</bundles_post_ra>
